<compile_context>
chip_gen: v6e
topology: v6e:2x2x1
jax: 0.10.0
libtpu: 0.0.40
codegen_flags: <defaults>
</compile_context>

<pallas_src>
import functools

import jax
import jax.numpy as jnp
from jax import lax
from jax.experimental import pallas as pl
from jax.experimental.pallas import tpu as pltpu


# ----------------------------------------------------------------------------
# Fused kernel: QKV projection + per-head attention + fused output projection.
# Grid: (batch, query_tile).  K/V scratch persists across query tiles.
# ----------------------------------------------------------------------------
def _sablock_kernel(x_ref, wq_ref, wkv_ref, wo_ref, bo_ref, o_ref,
                    kv_sc, q_sc, y_sc, *, num_heads, scale, tq, exp_dtype):
    S = x_ref.shape[1]
    H = x_ref.shape[2]
    Dh = H // num_heads
    cdtype = kv_sc.dtype                      # MXU operand dtype (bf16 by default)
    qi = pl.program_id(1)

    # K/V for the full sequence of this batch element: one wide (S,H)x(H,2H)
    # matmul at query tile 0, kept resident in VMEM scratch for later tiles.
    # NOTE: this relies on the qi grid axis being sequential ("arbitrary") and
    # on scratch persisting across grid steps — do NOT mark qi "parallel".
    @pl.when(qi == 0)
    def _():
        xb = x_ref[0].astype(cdtype)                                    # (S, H)
        kv_sc[...] = jnp.dot(xb, wkv_ref[...],
                             preferred_element_type=jnp.float32).astype(cdtype)

    q_start = pl.multiple_of(qi * tq, tq)
    x_tile = x_ref[0, pl.ds(q_start, tq), :].astype(cdtype)             # (tq, H)

    # Wide (N = H) Q projection for all heads at once; fold 1/sqrt(Dh) into q
    # (tq*H elements) instead of scaling the (tq, S) score matrices.
    q_all = jnp.dot(x_tile, wq_ref[...], preferred_element_type=jnp.float32)
    q_sc[...] = (q_all * scale).astype(cdtype)

    # Output accumulator, initialised with the output-projection bias.
    y_sc[...] = jnp.broadcast_to(bo_ref[...], (tq, H))

    # Static unroll over heads; each head's temporaries are retired immediately
    # by accumulating its output-projection contribution into y_sc.
    for h in range(num_heads):
        lo = h * Dh
        q_h = q_sc[:, lo:lo + Dh]                                       # (tq, Dh)
        k_h = kv_sc[:, lo:lo + Dh]                                      # (S, Dh)
        v_h = kv_sc[:, H + lo:H + lo + Dh]                              # (S, Dh)
        # q @ k^T contracting on Dh directly (no explicit transpose of k).
        s = lax.dot_general(q_h, k_h,
                            dimension_numbers=(((1,), (1,)), ((), ())),
                            preferred_element_type=jnp.float32)         # (tq, S)
        m = jnp.max(s, axis=-1, keepdims=True)
        # exp in bf16 on v6e/v7x (bf16 EUP ~2x throughput), f32 on v5e.
        p = jnp.exp((s - m).astype(exp_dtype))
        denom = jnp.sum(p, axis=-1, keepdims=True, dtype=jnp.float32)
        o_h = jnp.dot(p.astype(cdtype), v_h,
                      preferred_element_type=jnp.float32)               # (tq, Dh)
        # Deferred normalization on the small (tq, Dh) result (EUP reciprocal).
        o_h = (o_h * pl.reciprocal(denom, approx=True)).astype(cdtype)
        # Fused output projection: accumulate this head's (tq,Dh)x(Dh,H) slab.
        y_sc[...] += jnp.dot(o_h, wo_ref[lo:lo + Dh, :],
                             preferred_element_type=jnp.float32)
    # TODO(synk): dropout on attention weights / output omitted (rate=0.0 -> identity)

    # Lane-dense (1, tq, H) store.
    o_ref[0] = y_sc[...].astype(o_ref.dtype)


# ----------------------------------------------------------------------------
# Generation-aware helpers
# ----------------------------------------------------------------------------
def _device_kind():
    try:
        return jax.devices()[0].device_kind.lower()
    except Exception:
        return ""


def _vmem_capacity_bytes():
    try:
        return int(pltpu.get_tpu_info().vmem_capacity_bytes)
    except Exception:
        return 64 * 1024 * 1024          # conservative default (v7x per-TC)


def _softmax_exp_dtype():
    kind = _device_kind()
    # v6e / v7x have a bf16 EUP; v5e/v5p do not -> keep exp in f32 there.
    if "v6" in kind or "v7" in kind:
        return jnp.bfloat16
    return jnp.float32


def _pick_q_tile(S, max_tq):
    if S <= max_tq:
        return S
    for t in (max_tq, 512, 256, 128, 64, 32, 16, 8):
        if t <= max_tq and S % t == 0:
            return t
    return S


# ----------------------------------------------------------------------------
# One-time parameter preparation (transpose / cast / concat) — NOT on hot path.
# ----------------------------------------------------------------------------
def prepare_params(params, *, compute_dtype=jnp.bfloat16):
    """params: 'w_qkv' (3H, H), 'w_out' (H, H), 'b_out' (H,)  [PyTorch layout]."""
    w_qkv = jnp.asarray(params["w_qkv"])
    w_out = jnp.asarray(params["w_out"])
    b_out = jnp.asarray(params["b_out"])
    H = w_out.shape[0]
    # PyTorch Linear: y = x @ W^T.  Row index of w_qkv is qkv*(nh*Dh)+head*Dh+d
    # (einops '(qkv heads d)'), so reshape(3, H, H) splits q/k/v with output
    # features already ordered (head, d) — matching per-head column slices.
    w3 = w_qkv.reshape(3, H, H)
    wq_t = jnp.transpose(w3[0]).astype(compute_dtype)                   # (H, H)
    wk_t = jnp.transpose(w3[1]).astype(compute_dtype)                   # (H, H)
    wv_t = jnp.transpose(w3[2]).astype(compute_dtype)                   # (H, H)
    wkv_t = jnp.concatenate([wk_t, wv_t], axis=1)                       # (H, 2H)
    wo_t = jnp.transpose(w_out).astype(compute_dtype)                   # (H, H)
    bo = b_out.reshape(1, H).astype(jnp.float32)                        # (1, H)
    return {"wq_t": wq_t, "wkv_t": wkv_t, "wo_t": wo_t, "b_out": bo}


# ----------------------------------------------------------------------------
# Wrapper
# ----------------------------------------------------------------------------
def sablock_forward(x, prepared, *, num_heads, q_tile=None):
    """x: (B, S, H).  prepared: output of prepare_params()."""
    B, S, H = x.shape
    assert H % num_heads == 0
    Dh = H // num_heads
    scale = float(Dh) ** -0.5

    wq_t, wkv_t, wo_t, bo = (prepared["wq_t"], prepared["wkv_t"],
                             prepared["wo_t"], prepared["b_out"])
    assert wq_t.shape == (H, H) and wkv_t.shape == (H, 2 * H)
    cdtype = wq_t.dtype
    exp_dtype = _softmax_exp_dtype()

    vmem_cap = _vmem_capacity_bytes()
    # v7x has only 64 MiB VMEM per TensorCore -> smaller query tiles there.
    max_tq = 512 if vmem_cap >= 96 * 1024 * 1024 else 256
    tq = _pick_q_tile(S, max_tq) if q_tile is None else q_tile
    assert S % tq == 0 and (tq == S or tq % 8 == 0)
    nq = S // tq

    # VMEM budget: x double-buffer, resident weights (worst-case 2 buffers),
    # output double-buffer, KV / Q / accumulator scratch, and the per-head f32
    # score temporaries — clamped below the physical capacity per generation.
    w_isz = jnp.dtype(cdtype).itemsize
    x_isz = jnp.dtype(x.dtype).itemsize
    est = (2 * S * H * x_isz             # x block (double-buffered)
           + 2 * 4 * H * H * w_isz       # wq + wkv + wo (worst-case 2 buffers)
           + 4 * H * 4                   # bias
           + 2 * tq * H * x_isz          # output double buffer
           + S * 2 * H * w_isz           # K|V scratch
           + tq * H * w_isz              # scaled Q scratch
           + tq * H * 4                  # output-projection accumulator
           + 3 * tq * S * 4              # score / prob temporaries (f32)
           + 2 * tq * H * 4)             # misc f32 temporaries
    cap = vmem_cap * 7 // 8              # ~56 MiB on v7x, ~112 MiB on v5e/v6e
    vmem_bytes = int(min(cap, max(32 * 1024 * 1024, int(est * 1.5))))

    kernel = functools.partial(_sablock_kernel, num_heads=num_heads,
                               scale=scale, tq=tq, exp_dtype=exp_dtype)

    # TODO(synk): with B == 1 only one v7x TensorCore gets work (the qi axis
    # must stay sequential for the K/V-resident trick); restructure if needed.
    return pl.pallas_call(
        kernel,
        out_shape=jax.ShapeDtypeStruct((B, S, H), x.dtype),
        grid_spec=pltpu.PrefetchScalarGridSpec(
            num_scalar_prefetch=0,
            grid=(B, nq),
            in_specs=[
                # x: full-sequence block, resident across query tiles of batch b
                pl.BlockSpec((1, S, H), lambda b, qi: (b, 0, 0)),
                # weights / bias: constant index_map -> DMA'd once, stay resident
                pl.BlockSpec((H, H), lambda b, qi: (0, 0)),
                pl.BlockSpec((H, 2 * H), lambda b, qi: (0, 0)),
                pl.BlockSpec((H, H), lambda b, qi: (0, 0)),
                pl.BlockSpec((1, H), lambda b, qi: (0, 0)),
            ],
            out_specs=pl.BlockSpec((1, tq, H), lambda b, qi: (b, qi, 0)),
            scratch_shapes=[
                pltpu.VMEM((S, 2 * H), cdtype),     # K|V, all heads, full sequence
                pltpu.VMEM((tq, H), cdtype),        # scaled Q tile
                pltpu.VMEM((tq, H), jnp.float32),   # output-projection accumulator
            ],
        ),
        compiler_params=pltpu.CompilerParams(
            dimension_semantics=("parallel", "arbitrary"),
            vmem_limit_bytes=vmem_bytes,
        ),
    )(x, wq_t, wkv_t, wo_t, bo)


# Pure-JAX reference (mirrors the PyTorch forward) for a sanity check.
def sablock_ref(x, params, *, num_heads):
    B, S, H = x.shape
    Dh = H // num_heads
    scale = float(Dh) ** -0.5
    qkv = x @ params["w_qkv"].T                                          # (B, S, 3H)
    qkv = qkv.reshape(B, S, 3, num_heads, Dh)
    qkv = jnp.transpose(qkv, (2, 0, 3, 1, 4))                            # (3, B, nh, S, Dh)
    q, k, v = qkv[0], qkv[1], qkv[2]
    att = jax.nn.softmax(jnp.einsum("blxd,blyd->blxy", q, k) * scale, axis=-1)
    o = jnp.einsum("bhxy,bhyd->bhxd", att, v)
    o = jnp.transpose(o, (0, 2, 1, 3)).reshape(B, S, H)
    return o @ params["w_out"].T + params["b_out"]


if __name__ == "__main__":
    B, S, hidden, num_heads = 2, 8, 32, 4

    key = jax.random.PRNGKey(0)
    k1, k2, k3, k4 = jax.random.split(key, 4)
    x = jax.random.normal(k1, (B, S, hidden), dtype=jnp.float32)
    params = {
        "w_qkv": jax.random.normal(k2, (3 * hidden, hidden), jnp.float32) * 0.1,
        "w_out": jax.random.normal(k3, (hidden, hidden), jnp.float32) * 0.1,
        "b_out": jax.random.normal(k4, (hidden,), jnp.float32) * 0.1,
    }

    prepared = prepare_params(params, compute_dtype=jnp.bfloat16)
    y = sablock_forward(x, prepared, num_heads=num_heads)
    y = jax.block_until_ready(y)

    y_ref = sablock_ref(x, params, num_heads=num_heads)
    assert y.shape == (B, S, hidden)
    # bf16 MXU operands + approx EUP reciprocal (and bf16 exp on v6e/v7x)
    # -> looser tolerance than pure-f32.
    assert jnp.allclose(y, y_ref, atol=3e-2, rtol=3e-2), "mismatch vs reference"

    print("KERNEL_OK")
</pallas_src>

<mosaic_0001>
module attributes {stable_mosaic.version = 11 : i64} {
  func.func @_sablock_kernel(%arg0: i32, %arg1: i32, %arg2: memref<1x8x32xf32, #tpu.memory_space<vmem>>, %arg3: memref<32x32xbf16, #tpu.memory_space<vmem>>, %arg4: memref<32x64xbf16, #tpu.memory_space<vmem>>, %arg5: memref<32x32xbf16, #tpu.memory_space<vmem>>, %arg6: memref<1x32xf32, #tpu.memory_space<vmem>>, %arg7: memref<1x8x32xf32, #tpu.memory_space<vmem>>, %arg8: memref<8x64xbf16, #tpu.memory_space<vmem>>, %arg9: memref<8x32xbf16, #tpu.memory_space<vmem>>, %arg10: memref<8x32xf32, #tpu.memory_space<vmem>>) attributes {dimension_semantics = [#tpu.dimension_semantics<parallel>, #tpu.dimension_semantics<arbitrary>], iteration_bounds = array<i64: 2, 1>, scalar_prefetch = 0 : i64, scratch_operands = 3 : i64, tpu.core_type = #tpu.core_type<tc>, window_params = [{transform_indices = @transform_0, window_bounds = array<i64: 1, 8, 32>}, {pipeline_mode = #tpu.pipeline_mode<synchronous>, transform_indices = @transform_1, window_bounds = array<i64: 32, 32>}, {pipeline_mode = #tpu.pipeline_mode<synchronous>, transform_indices = @transform_2, window_bounds = array<i64: 32, 64>}, {pipeline_mode = #tpu.pipeline_mode<synchronous>, transform_indices = @transform_3, window_bounds = array<i64: 32, 32>}, {pipeline_mode = #tpu.pipeline_mode<synchronous>, transform_indices = @transform_4, window_bounds = array<i64: 1, 32>}, {transform_indices = @transform_5, window_bounds = array<i64: 1, 8, 32>}]} {
    %c0_i32 = arith.constant 0 : i32
    %0 = arith.cmpi eq, %arg1, %c0_i32 : i32
    %1 = arith.extui %0 : i1 to i32
    %c0_i32_0 = arith.constant 0 : i32
    %2 = arith.cmpi ne, %1, %c0_i32_0 : i32
    scf.if %2 {
      %c0_77 = arith.constant 0 : index
      %c0_78 = arith.constant 0 : index
      %c0_79 = arith.constant 0 : index
      %111 = vector.load %arg2[%c0_77, %c0_78, %c0_79] : memref<1x8x32xf32, #tpu.memory_space<vmem>>, vector<1x8x32xf32>
      %112 = vector.shape_cast %111 : vector<1x8x32xf32> to vector<8x32xf32>
      %113 = arith.truncf %112 : vector<8x32xf32> to vector<8x32xbf16>
      %c0_80 = arith.constant 0 : index
      %c0_81 = arith.constant 0 : index
      %114 = vector.load %arg4[%c0_80, %c0_81] : memref<32x64xbf16, #tpu.memory_space<vmem>>, vector<32x64xbf16>
      %cst_82 = arith.constant dense<0.000000e+00> : vector<8x64xf32>
      %115 = tpu.matmul %113, %114, %cst_82 {dimension_numbers = #tpu.dot_dimension_numbers<[1], [0], [0], [1], [0, 0, 1, 1], [], []>} : vector<8x32xbf16>, vector<32x64xbf16>, vector<8x64xf32> -> vector<8x64xf32>
      %116 = arith.truncf %115 : vector<8x64xf32> to vector<8x64xbf16>
      %c0_83 = arith.constant 0 : index
      %c0_84 = arith.constant 0 : index
      %117 = vector.load %arg8[%c0_83, %c0_84] : memref<8x64xbf16, #tpu.memory_space<vmem>>, vector<8x64xbf16>
      tpu.vector_store %arg8[%c0_83, %c0_84], %116 {strides = array<i32>} : memref<8x64xbf16, #tpu.memory_space<vmem>>, vector<8x64xbf16>,
    } else {
    }
    %c8_i32 = arith.constant 8 : i32
    %3 = arith.muli %arg1, %c8_i32 : i32
    %4 = tpu.assume_multiple %3, 8 : i32
    %c0 = arith.constant 0 : index
    %5 = arith.index_cast %4 : i32 to index
    %c0_1 = arith.constant 0 : index
    %6 = vector.load %arg2[%c0, %5, %c0_1] : memref<1x8x32xf32, #tpu.memory_space<vmem>>, vector<1x8x32xf32>
    %7 = vector.shape_cast %6 : vector<1x8x32xf32> to vector<8x32xf32>
    %8 = arith.truncf %7 : vector<8x32xf32> to vector<8x32xbf16>
    %c0_2 = arith.constant 0 : index
    %c0_3 = arith.constant 0 : index
    %9 = vector.load %arg3[%c0_2, %c0_3] : memref<32x32xbf16, #tpu.memory_space<vmem>>, vector<32x32xbf16>
    %cst = arith.constant dense<0.000000e+00> : vector<8x32xf32>
    %10 = tpu.matmul %8, %9, %cst {dimension_numbers = #tpu.dot_dimension_numbers<[1], [0], [0], [1], [0, 0, 1, 1], [], []>} : vector<8x32xbf16>, vector<32x32xbf16>, vector<8x32xf32> -> vector<8x32xf32>
    %cst_4 = arith.constant 0.353553385 : f32
    %11 = vector.broadcast %cst_4 : f32 to vector<8x32xf32>
    %12 = arith.mulf %10, %11 : vector<8x32xf32>
    %13 = arith.truncf %12 : vector<8x32xf32> to vector<8x32xbf16>
    %c0_5 = arith.constant 0 : index
    %c0_6 = arith.constant 0 : index
    %14 = vector.load %arg9[%c0_5, %c0_6] : memref<8x32xbf16, #tpu.memory_space<vmem>>, vector<8x32xbf16>
    tpu.vector_store %arg9[%c0_5, %c0_6], %13 {strides = array<i32>} : memref<8x32xbf16, #tpu.memory_space<vmem>>, vector<8x32xbf16>,
    %c0_7 = arith.constant 0 : index
    %c0_8 = arith.constant 0 : index
    %15 = vector.load %arg6[%c0_7, %c0_8] : memref<1x32xf32, #tpu.memory_space<vmem>>, vector<1x32xf32>
    %16 = vector.shape_cast %15 : vector<1x32xf32> to vector<1x32xf32>
    %17 = vector.broadcast %16 : vector<1x32xf32> to vector<8x32xf32>
    %c0_9 = arith.constant 0 : index
    %c0_10 = arith.constant 0 : index
    %18 = vector.load %arg10[%c0_9, %c0_10] : memref<8x32xf32, #tpu.memory_space<vmem>>, vector<8x32xf32>
    tpu.vector_store %arg10[%c0_9, %c0_10], %17 {strides = array<i32>} : memref<8x32xf32, #tpu.memory_space<vmem>>, vector<8x32xf32>,
    %c0_11 = arith.constant 0 : index
    %c0_12 = arith.constant 0 : index
    %19 = vector.load %arg9[%c0_11, %c0_12] : memref<8x32xbf16, #tpu.memory_space<vmem>>, vector<8x8xbf16>
    %c0_13 = arith.constant 0 : index
    %c0_14 = arith.constant 0 : index
    %20 = vector.load %arg8[%c0_13, %c0_14] : memref<8x64xbf16, #tpu.memory_space<vmem>>, vector<8x8xbf16>
    %c0_15 = arith.constant 0 : index
    %c32 = arith.constant 32 : index
    %21 = vector.load %arg8[%c0_15, %c32] : memref<8x64xbf16, #tpu.memory_space<vmem>>, vector<8x8xbf16>
    %cst_16 = arith.constant dense<0.000000e+00> : vector<8x8xf32>
    %22 = tpu.matmul %19, %20, %cst_16 {dimension_numbers = #tpu.dot_dimension_numbers<[1], [1], [0], [0], [0, 0, 1, 0], [], []>} : vector<8x8xbf16>, vector<8x8xbf16>, vector<8x8xf32> -> vector<8x8xf32>
    %cst_17 = arith.constant dense<0xFF800000> : vector<8xf32>
    %23 = vector.multi_reduction <maximumf>, %22, %cst_17 [1] : vector<8x8xf32> to vector<8xf32>
    %24 = vector.shape_cast %23 : vector<8xf32> to vector<8x1xf32>
    %25 = vector.broadcast %24 : vector<8x1xf32> to vector<8x8xf32>
    %26 = arith.subf %22, %25 : vector<8x8xf32>
    %27 = math.exp %26 : vector<8x8xf32>
    %cst_18 = arith.constant dense<0.000000e+00> : vector<8xf32>
    %28 = vector.multi_reduction <add>, %27, %cst_18 [1] : vector<8x8xf32> to vector<8xf32>
    %29 = vector.shape_cast %28 : vector<8xf32> to vector<8x1xf32>
    %30 = arith.truncf %27 : vector<8x8xf32> to vector<8x8xbf16>
    %cst_19 = arith.constant dense<0.000000e+00> : vector<8x8xf32>
    %31 = tpu.matmul %30, %21, %cst_19 {dimension_numbers = #tpu.dot_dimension_numbers<[1], [0], [0], [1], [0, 0, 1, 1], [], []>} : vector<8x8xbf16>, vector<8x8xbf16>, vector<8x8xf32> -> vector<8x8xf32>
    %32 = tpu.reciprocal %29 {approx = true} : vector<8x1xf32> -> vector<8x1xf32>
    %33 = vector.broadcast %32 : vector<8x1xf32> to vector<8x8xf32>
    %34 = arith.mulf %31, %33 : vector<8x8xf32>
    %35 = arith.truncf %34 : vector<8x8xf32> to vector<8x8xbf16>
    %c0_20 = arith.constant 0 : index
    %c0_21 = arith.constant 0 : index
    %36 = vector.load %arg10[%c0_20, %c0_21] : memref<8x32xf32, #tpu.memory_space<vmem>>, vector<8x32xf32>
    %c0_22 = arith.constant 0 : index
    %c0_23 = arith.constant 0 : index
    %37 = vector.load %arg5[%c0_22, %c0_23] : memref<32x32xbf16, #tpu.memory_space<vmem>>, vector<8x32xbf16>
    %cst_24 = arith.constant dense<0.000000e+00> : vector<8x32xf32>
    %38 = tpu.matmul %35, %37, %cst_24 {dimension_numbers = #tpu.dot_dimension_numbers<[1], [0], [0], [1], [0, 0, 1, 1], [], []>} : vector<8x8xbf16>, vector<8x32xbf16>, vector<8x32xf32> -> vector<8x32xf32>
    %39 = arith.addf %36, %38 : vector<8x32xf32>
    %c0_25 = arith.constant 0 : index
    %c0_26 = arith.constant 0 : index
    %40 = vector.load %arg10[%c0_25, %c0_26] : memref<8x32xf32, #tpu.memory_space<vmem>>, vector<8x32xf32>
    tpu.vector_store %arg10[%c0_25, %c0_26], %39 {strides = array<i32>} : memref<8x32xf32, #tpu.memory_space<vmem>>, vector<8x32xf32>,
    %c0_27 = arith.constant 0 : index
    %c8 = arith.constant 8 : index
    %41 = vector.load %arg9[%c0_27, %c8] : memref<8x32xbf16, #tpu.memory_space<vmem>>, vector<8x8xbf16>
    %c0_28 = arith.constant 0 : index
    %c8_29 = arith.constant 8 : index
    %42 = vector.load %arg8[%c0_28, %c8_29] : memref<8x64xbf16, #tpu.memory_space<vmem>>, vector<8x8xbf16>
    %c0_30 = arith.constant 0 : index
    %c40 = arith.constant 40 : index
    %43 = vector.load %arg8[%c0_30, %c40] : memref<8x64xbf16, #tpu.memory_space<vmem>>, vector<8x8xbf16>
    %cst_31 = arith.constant dense<0.000000e+00> : vector<8x8xf32>
    %44 = tpu.matmul %41, %42, %cst_31 {dimension_numbers = #tpu.dot_dimension_numbers<[1], [1], [0], [0], [0, 0, 1, 0], [], []>} : vector<8x8xbf16>, vector<8x8xbf16>, vector<8x8xf32> -> vector<8x8xf32>
    %cst_32 = arith.constant dense<0xFF800000> : vector<8xf32>
    %45 = vector.multi_reduction <maximumf>, %44, %cst_32 [1] : vector<8x8xf32> to vector<8xf32>
    %46 = vector.shape_cast %45 : vector<8xf32> to vector<8x1xf32>
    %47 = vector.broadcast %46 : vector<8x1xf32> to vector<8x8xf32>
    %48 = arith.subf %44, %47 : vector<8x8xf32>
    %49 = math.exp %48 : vector<8x8xf32>
    %cst_33 = arith.constant dense<0.000000e+00> : vector<8xf32>
    %50 = vector.multi_reduction <add>, %49, %cst_33 [1] : vector<8x8xf32> to vector<8xf32>
    %51 = vector.shape_cast %50 : vector<8xf32> to vector<8x1xf32>
    %52 = arith.truncf %49 : vector<8x8xf32> to vector<8x8xbf16>
    %cst_34 = arith.constant dense<0.000000e+00> : vector<8x8xf32>
    %53 = tpu.matmul %52, %43, %cst_34 {dimension_numbers = #tpu.dot_dimension_numbers<[1], [0], [0], [1], [0, 0, 1, 1], [], []>} : vector<8x8xbf16>, vector<8x8xbf16>, vector<8x8xf32> -> vector<8x8xf32>
    %54 = tpu.reciprocal %51 {approx = true} : vector<8x1xf32> -> vector<8x1xf32>
    %55 = vector.broadcast %54 : vector<8x1xf32> to vector<8x8xf32>
    %56 = arith.mulf %53, %55 : vector<8x8xf32>
    %57 = arith.truncf %56 : vector<8x8xf32> to vector<8x8xbf16>
    %c0_35 = arith.constant 0 : index
    %c0_36 = arith.constant 0 : index
    %58 = vector.load %arg10[%c0_35, %c0_36] : memref<8x32xf32, #tpu.memory_space<vmem>>, vector<8x32xf32>
    %c8_37 = arith.constant 8 : index
    %c0_38 = arith.constant 0 : index
    %59 = vector.load %arg5[%c8_37, %c0_38] : memref<32x32xbf16, #tpu.memory_space<vmem>>, vector<8x32xbf16>
    %cst_39 = arith.constant dense<0.000000e+00> : vector<8x32xf32>
    %60 = tpu.matmul %57, %59, %cst_39 {dimension_numbers = #tpu.dot_dimension_numbers<[1], [0], [0], [1], [0, 0, 1, 1], [], []>} : vector<8x8xbf16>, vector<8x32xbf16>, vector<8x32xf32> -> vector<8x32xf32>
    %61 = arith.addf %58, %60 : vector<8x32xf32>
    %c0_40 = arith.constant 0 : index
    %c0_41 = arith.constant 0 : index
    %62 = vector.load %arg10[%c0_40, %c0_41] : memref<8x32xf32, #tpu.memory_space<vmem>>, vector<8x32xf32>
    tpu.vector_store %arg10[%c0_40, %c0_41], %61 {strides = array<i32>} : memref<8x32xf32, #tpu.memory_space<vmem>>, vector<8x32xf32>,
    %c0_42 = arith.constant 0 : index
    %c16 = arith.constant 16 : index
    %63 = vector.load %arg9[%c0_42, %c16] : memref<8x32xbf16, #tpu.memory_space<vmem>>, vector<8x8xbf16>
    %c0_43 = arith.constant 0 : index
    %c16_44 = arith.constant 16 : index
    %64 = vector.load %arg8[%c0_43, %c16_44] : memref<8x64xbf16, #tpu.memory_space<vmem>>, vector<8x8xbf16>
    %c0_45 = arith.constant 0 : index
    %c48 = arith.constant 48 : index
    %65 = vector.load %arg8[%c0_45, %c48] : memref<8x64xbf16, #tpu.memory_space<vmem>>, vector<8x8xbf16>
    %cst_46 = arith.constant dense<0.000000e+00> : vector<8x8xf32>
    %66 = tpu.matmul %63, %64, %cst_46 {dimension_numbers = #tpu.dot_dimension_numbers<[1], [1], [0], [0], [0, 0, 1, 0], [], []>} : vector<8x8xbf16>, vector<8x8xbf16>, vector<8x8xf32> -> vector<8x8xf32>
    %cst_47 = arith.constant dense<0xFF800000> : vector<8xf32>
    %67 = vector.multi_reduction <maximumf>, %66, %cst_47 [1] : vector<8x8xf32> to vector<8xf32>
    %68 = vector.shape_cast %67 : vector<8xf32> to vector<8x1xf32>
    %69 = vector.broadcast %68 : vector<8x1xf32> to vector<8x8xf32>
    %70 = arith.subf %66, %69 : vector<8x8xf32>
    %71 = math.exp %70 : vector<8x8xf32>
    %cst_48 = arith.constant dense<0.000000e+00> : vector<8xf32>
    %72 = vector.multi_reduction <add>, %71, %cst_48 [1] : vector<8x8xf32> to vector<8xf32>
    %73 = vector.shape_cast %72 : vector<8xf32> to vector<8x1xf32>
    %74 = arith.truncf %71 : vector<8x8xf32> to vector<8x8xbf16>
    %cst_49 = arith.constant dense<0.000000e+00> : vector<8x8xf32>
    %75 = tpu.matmul %74, %65, %cst_49 {dimension_numbers = #tpu.dot_dimension_numbers<[1], [0], [0], [1], [0, 0, 1, 1], [], []>} : vector<8x8xbf16>, vector<8x8xbf16>, vector<8x8xf32> -> vector<8x8xf32>
    %76 = tpu.reciprocal %73 {approx = true} : vector<8x1xf32> -> vector<8x1xf32>
    %77 = vector.broadcast %76 : vector<8x1xf32> to vector<8x8xf32>
    %78 = arith.mulf %75, %77 : vector<8x8xf32>
    %79 = arith.truncf %78 : vector<8x8xf32> to vector<8x8xbf16>
    %c0_50 = arith.constant 0 : index
    %c0_51 = arith.constant 0 : index
    %80 = vector.load %arg10[%c0_50, %c0_51] : memref<8x32xf32, #tpu.memory_space<vmem>>, vector<8x32xf32>
    %c16_52 = arith.constant 16 : index
    %c0_53 = arith.constant 0 : index
    %81 = vector.load %arg5[%c16_52, %c0_53] : memref<32x32xbf16, #tpu.memory_space<vmem>>, vector<8x32xbf16>
    %cst_54 = arith.constant dense<0.000000e+00> : vector<8x32xf32>
    %82 = tpu.matmul %79, %81, %cst_54 {dimension_numbers = #tpu.dot_dimension_numbers<[1], [0], [0], [1], [0, 0, 1, 1], [], []>} : vector<8x8xbf16>, vector<8x32xbf16>, vector<8x32xf32> -> vector<8x32xf32>
    %83 = arith.addf %80, %82 : vector<8x32xf32>
    %c0_55 = arith.constant 0 : index
    %c0_56 = arith.constant 0 : index
    %84 = vector.load %arg10[%c0_55, %c0_56] : memref<8x32xf32, #tpu.memory_space<vmem>>, vector<8x32xf32>
    tpu.vector_store %arg10[%c0_55, %c0_56], %83 {strides = array<i32>} : memref<8x32xf32, #tpu.memory_space<vmem>>, vector<8x32xf32>,
    %c0_57 = arith.constant 0 : index
    %c24 = arith.constant 24 : index
    %85 = vector.load %arg9[%c0_57, %c24] : memref<8x32xbf16, #tpu.memory_space<vmem>>, vector<8x8xbf16>
    %c0_58 = arith.constant 0 : index
    %c24_59 = arith.constant 24 : index
    %86 = vector.load %arg8[%c0_58, %c24_59] : memref<8x64xbf16, #tpu.memory_space<vmem>>, vector<8x8xbf16>
    %c0_60 = arith.constant 0 : index
    %c56 = arith.constant 56 : index
    %87 = vector.load %arg8[%c0_60, %c56] : memref<8x64xbf16, #tpu.memory_space<vmem>>, vector<8x8xbf16>
    %cst_61 = arith.constant dense<0.000000e+00> : vector<8x8xf32>
    %88 = tpu.matmul %85, %86, %cst_61 {dimension_numbers = #tpu.dot_dimension_numbers<[1], [1], [0], [0], [0, 0, 1, 0], [], []>} : vector<8x8xbf16>, vector<8x8xbf16>, vector<8x8xf32> -> vector<8x8xf32>
    %cst_62 = arith.constant dense<0xFF800000> : vector<8xf32>
    %89 = vector.multi_reduction <maximumf>, %88, %cst_62 [1] : vector<8x8xf32> to vector<8xf32>
    %90 = vector.shape_cast %89 : vector<8xf32> to vector<8x1xf32>
    %91 = vector.broadcast %90 : vector<8x1xf32> to vector<8x8xf32>
    %92 = arith.subf %88, %91 : vector<8x8xf32>
    %93 = math.exp %92 : vector<8x8xf32>
    %cst_63 = arith.constant dense<0.000000e+00> : vector<8xf32>
    %94 = vector.multi_reduction <add>, %93, %cst_63 [1] : vector<8x8xf32> to vector<8xf32>
    %95 = vector.shape_cast %94 : vector<8xf32> to vector<8x1xf32>
    %96 = arith.truncf %93 : vector<8x8xf32> to vector<8x8xbf16>
    %cst_64 = arith.constant dense<0.000000e+00> : vector<8x8xf32>
    %97 = tpu.matmul %96, %87, %cst_64 {dimension_numbers = #tpu.dot_dimension_numbers<[1], [0], [0], [1], [0, 0, 1, 1], [], []>} : vector<8x8xbf16>, vector<8x8xbf16>, vector<8x8xf32> -> vector<8x8xf32>
    %98 = tpu.reciprocal %95 {approx = true} : vector<8x1xf32> -> vector<8x1xf32>
    %99 = vector.broadcast %98 : vector<8x1xf32> to vector<8x8xf32>
    %100 = arith.mulf %97, %99 : vector<8x8xf32>
    %101 = arith.truncf %100 : vector<8x8xf32> to vector<8x8xbf16>
    %c0_65 = arith.constant 0 : index
    %c0_66 = arith.constant 0 : index
    %102 = vector.load %arg10[%c0_65, %c0_66] : memref<8x32xf32, #tpu.memory_space<vmem>>, vector<8x32xf32>
    %c24_67 = arith.constant 24 : index
    %c0_68 = arith.constant 0 : index
    %103 = vector.load %arg5[%c24_67, %c0_68] : memref<32x32xbf16, #tpu.memory_space<vmem>>, vector<8x32xbf16>
    %cst_69 = arith.constant dense<0.000000e+00> : vector<8x32xf32>
    %104 = tpu.matmul %101, %103, %cst_69 {dimension_numbers = #tpu.dot_dimension_numbers<[1], [0], [0], [1], [0, 0, 1, 1], [], []>} : vector<8x8xbf16>, vector<8x32xbf16>, vector<8x32xf32> -> vector<8x32xf32>
    %105 = arith.addf %102, %104 : vector<8x32xf32>
    %c0_70 = arith.constant 0 : index
    %c0_71 = arith.constant 0 : index
    %106 = vector.load %arg10[%c0_70, %c0_71] : memref<8x32xf32, #tpu.memory_space<vmem>>, vector<8x32xf32>
    tpu.vector_store %arg10[%c0_70, %c0_71], %105 {strides = array<i32>} : memref<8x32xf32, #tpu.memory_space<vmem>>, vector<8x32xf32>,
    %c0_72 = arith.constant 0 : index
    %c0_73 = arith.constant 0 : index
    %107 = vector.load %arg10[%c0_72, %c0_73] : memref<8x32xf32, #tpu.memory_space<vmem>>, vector<8x32xf32>
    %c0_74 = arith.constant 0 : index
    %c0_75 = arith.constant 0 : index
    %c0_76 = arith.constant 0 : index
    %108 = vector.load %arg7[%c0_74, %c0_75, %c0_76] : memref<1x8x32xf32, #tpu.memory_space<vmem>>, vector<1x8x32xf32>
    %109 = vector.shape_cast %108 : vector<1x8x32xf32> to vector<8x32xf32>
    %110 = vector.shape_cast %107 : vector<8x32xf32> to vector<1x8x32xf32>
    tpu.vector_store %arg7[%c0_74, %c0_75, %c0_76], %110 {strides = array<i32>} : memref<1x8x32xf32, #tpu.memory_space<vmem>>, vector<1x8x32xf32>,
    return
  }
  func.func @transform_0(%arg0: i32, %arg1: i32) -> (i32, i32, i32) {
    %c0_i32 = arith.constant 0 : i32
    %c0_i32_0 = arith.constant 0 : i32
    %c0_i32_1 = arith.constant 0 : i32
    return %arg0, %c0_i32, %c0_i32_0 : i32, i32, i32
  }
  func.func @transform_1(%arg0: i32, %arg1: i32) -> (i32, i32) {
    %c0_i32 = arith.constant 0 : i32
    %c0_i32_0 = arith.constant 0 : i32
    %c0_i32_1 = arith.constant 0 : i32
    return %c0_i32, %c0_i32_0 : i32, i32
  }
  func.func @transform_2(%arg0: i32, %arg1: i32) -> (i32, i32) {
    %c0_i32 = arith.constant 0 : i32
    %c0_i32_0 = arith.constant 0 : i32
    %c0_i32_1 = arith.constant 0 : i32
    return %c0_i32, %c0_i32_0 : i32, i32
  }
  func.func @transform_3(%arg0: i32, %arg1: i32) -> (i32, i32) {
    %c0_i32 = arith.constant 0 : i32
    %c0_i32_0 = arith.constant 0 : i32
    %c0_i32_1 = arith.constant 0 : i32
    return %c0_i32, %c0_i32_0 : i32, i32
  }
  func.func @transform_4(%arg0: i32, %arg1: i32) -> (i32, i32) {
    %c0_i32 = arith.constant 0 : i32
    %c0_i32_0 = arith.constant 0 : i32
    %c0_i32_1 = arith.constant 0 : i32
    return %c0_i32, %c0_i32_0 : i32, i32
  }
  func.func @transform_5(%arg0: i32, %arg1: i32) -> (i32, i32, i32) {
    %c0_i32 = arith.constant 0 : i32
    %c0_i32_0 = arith.constant 0 : i32
    return %arg0, %arg1, %c0_i32 : i32, i32, i32
  }
}

</mosaic_0001>

<bundles_post_ra>
// kernel: tpu_custom_call.1
= control target key start
LH: loop header
LB: loop body
LE: loop exit
PB: predicated region body
PF: predicated region fallthrough
CT: control target
= control target key end

     0   :  { %s2063_s0 = inlined_call_operand.hbm [shape: f32[2,8,32], index: 0, kind: input, shape index: {}]   ;;  %s2064_s1 = inlined_call_operand.hbm [shape: bf16[32,32], index: 1, kind: input, shape index: {}]   ;;  %s2065_s2 = inlined_call_operand.hbm [shape: bf16[32,64], index: 2, kind: input, shape index: {}]   ;;  %s2066_s3 = inlined_call_operand.hbm [shape: bf16[32,32], index: 3, kind: input, shape index: {}]   ;;  %s2067_s4 = inlined_call_operand.vmem [shape: f32[1,32], index: 4, kind: input, shape index: {}]   ;;  %s2068_s5 = inlined_call_operand.hbm [shape: f32[2,8,32], index: 5, kind: output, shape index: {}]  }
   0x1   :  { %2073 = sst [smem:[#allocation18_spill]] %s2064_s1 }
   0x2   :  { %10 = vsyncpa [#allocation6], 0 }
   0x3   :  { %12 = vsyncpa [#allocation6 + $0x1], 0 }
   0x4   :  { %13 = vsyncpa [#allocation9], 0 }
   0x5   :  { %14 = vsyncpa [#allocation12], 0 }
   0x6   :  { %15 = vsyncpa [#allocation7], 0 }
   0x7   :  { %17 = vsyncpa [#allocation7 + $0x1], 0  ;;  %s1778_s18 = smov 0   ;;  %s1780_s19 = smov 0  }
   0x8   :  { %s1782_s20 = smov 0   ;;  %s1784_s21 = smov 0  }
   0x9   :  { %s1786_s22 = smov 0   ;;  %s1788_s23 = smov 0  }
   0xa LB: > { %s1242_s24 = sadd.s32 4294967295, %s1730_s23   ;;  %s1243_s25 = sadd.s32 4294967294, %s1730_s23   ;;  %s1730_s23 = sphi %s1788_s23, %s23_s23   ;;  %s1726_s22 = sphi %s1786_s22, %s2092_s22   ;;  %s1722_s21 = sphi %s1784_s21, %s2091_s21   ;;  %s1718_s20 = sphi %s1782_s20, %s2090_s20   ;;  %s1714_s19 = sphi %s1780_s19, %s2089_s19   ;;  %s1710_s18 = sphi %s1778_s18, %s2088_s18  }
   0xb   : > { %p55_p0 = scmp.ne.s32.totalorder %s1714_s19, %s1710_s18  ;;  %p1812_p1 = scmp.eq.s32.totalorder %s1242_s24, 0 }
   0xc   : > { %p1816_p2 = scmp.eq.s32.totalorder %s1242_s24, 1  ;;  %p171_p3 = scmp.eq.s32.totalorder %s1243_s25, 1 }
   0xd   : > { %s2074_s26 = scalar_select %p1812_p1, 1, 0 }
   0xe   : > { %p1822_p4 = por %p1812_p1, %p55_p0  ;;  %p1244_p5 = scmp.ge.s32.totalorder %s1730_s23, 1 }
   0xf   : > { %p1827_p6 = por %p171_p3, %p55_p0  ;;  %p178_p7 = scmp.lt.s32.totalorder %s1730_s23, 3 }
  0x10   : > { %s2076_s28 = scalar_select %p1822_p4, 1, 0 }
  0x11   : > { %s2077_s29 = scalar_select %p1827_p6, 1, 0 }
  0x12   : > { %p1832_p8 = pnand %p1244_p5, %p178_p7  ;;  %s1732_s6 = smov [#allocation8]  }
  0x13   : > { %s190_s7 = sshll.u32 %s1732_s6, 4  ;;  %s1733_s9 = smov [#allocation10]   ;;  %s191_s7 = int_to_ptr.vmem [resolvable:$true] %s190_s7 }
  0x14   : > { %s2078_s30 = scalar_select %p1832_p8, 1, 0 }
  0x15   : > { %p1421_p9 = pneg %p1832_p8  ;;  %s203_s10 = sshll.u32 %s1733_s9, 4  ;;  %s204_s10 = int_to_ptr.vmem [resolvable:$true] %s203_s10 }
  0x16   : > { %s1734_s11 = smov [#allocation11]   ;;  %s1547_s13 = scalar_lea.vmem %s191_s7, 256 }
  0x17   : > { %p1841_p11 = pnand %p1421_p9, %p1812_p1  ;;  %s216_s12 = sshll.u32 %s1734_s11, 4  ;;  %s217_s12 = int_to_ptr.vmem [resolvable:$true] %s216_s12 }
  0x18   : > { %p1548_p13 = scmp.ne.s32.totalorder %s191_s7, %s1547_s13  ;;  %p1555_p5 = scmp.lt.s32.totalorder %s191_s7, %s191_s7 }
  0x19   : > { %p1538_p12 = pneg %p1841_p11  ;;  %p1556_p7 = scmp.lt.s32.totalorder %s1547_s13, %s1547_s13 }
  0x1b   : > { %p1550_p0 = pnand %p1548_p13, %p1538_p12  ;;  %p1557_p9 = por %p1556_p7, %p1555_p5 }
  0x1d   : > { %p1551_p3 = pneg %p1550_p0 }
  0x1f   : > { %p1558_p10 = pnand %p1557_p9, %p1551_p3 }
  0x21   : > { %1561 = shalt.err (!%p1558_p10)
}
  0x22   : > { %s1735_s14 = smov 64   ;;  %s1736_s15 = smov 4  }
  0x23   : > { %s2080_s1 = sld [smem:[#allocation18_spill]]  ;;  %s1573_s24 = scalar_lea.vmem %s204_s10, 256 }
  0x24   : > { %p1574_p6 = scmp.ne.s32.totalorder %s204_s10, %s1573_s24  ;;  %p1581_p1 = scmp.lt.s32.totalorder %s204_s10, %s204_s10 }
  0x25   : > { %p1582_p4 = scmp.lt.s32.totalorder %s1573_s24, %s1573_s24 }
  0x26   : > { %p1576_p13 = pnand %p1574_p6, %p1538_p12 }
  0x27   : > { %p1583_p5 = por %p1582_p4, %p1581_p1 }
  0x28   : > { %p1577_p0 = pneg %p1576_p13 }
  0x29   : > { %1424 = dma.hbm_to_vmem [thread:$0]  (!%p1841_p11), %s2080_s1, 256, %s191_s7, [#allocation9], %s1735_s14, %s1735_s14, %s1736_s15  }
  0x2a   : > { %p1584_p3 = pnand %p1583_p5, %p1577_p0 }
  0x2c   : > { %1587 = shalt.err (!%p1584_p3)
}
  0x2d   : > { %1427 = dma.hbm_to_vmem [thread:$0]  (!%p1841_p11), %s2065_s2, 256, %s204_s10, [#allocation9], %s1735_s14, %s1735_s14, %s1736_s15  }
  0x2e   : > { %s1599_s7 = scalar_lea.vmem %s217_s12, 256  ;;  %p1607_p9 = scmp.lt.s32.totalorder %s217_s12, %s217_s12 }
  0x2f   : > { %p1600_p10 = scmp.ne.s32.totalorder %s217_s12, %s1599_s7  ;;  %p1608_p13 = scmp.lt.s32.totalorder %s1599_s7, %s1599_s7 }
  0x31   : > { %p1602_p7 = pnand %p1600_p10, %p1538_p12  ;;  %p1609_p8 = por %p1608_p13, %p1607_p9 }
  0x33   : > { %p1603_p6 = pneg %p1602_p7 }
  0x35   : > { %p1610_p1 = pnand %p1609_p8, %p1603_p6 }
  0x37   : > { %1613 = shalt.err (!%p1610_p1)
}
  0x38   : > { %1430 = dma.hbm_to_vmem [thread:$0]  (!%p1841_p11), %s2066_s3, 256, %s217_s12, [#allocation12], %s1735_s14, %s1735_s14, %s1736_s15  }
  0x39   : > { %s42_s10 = sadd.s32 1, %s1718_s20  ;;  %s35_s13 = sadd.s32 1, %s1726_s22 }
  0x3a   : > { %p49_p4 = scmp.ne.s32.totalorder %s1718_s20, %s1714_s19  ;;  %p37_p8 = scmp.ge.s32.totalorder %s35_s13, 2 }
  0x3b   : > { %p50_p12 = scmp.eq.s32.totalorder %s1730_s23, 0  ;;  %p1442_p5 = scmp.lt.s32.totalorder %s1730_s23, 2 }
  0x3c   : > { %p1878_p0 = por %p1816_p2, %p49_p4  ;;  %s2094_s13 = smov (%p37_p8, %s35_s13), 0 }
  0x3d   : > { %p51_p3 = por %p50_p12, %p49_p4  ;;  %s233_s16 = sand.u32 1, %s1718_s20  }
  0x3e   : > { %s39_s17 = ssub.s32 %s1726_s22, %s2094_s13  ;;  %s1249_s12 = sshll.u32 %s233_s16, 3 }
  0x3f   : > { %p40_p10 = scmp.eq.s32.totalorder %s39_s17, 0  ;;  %s1250_s14 = sshll.u32 %s1726_s22, 7 }
  0x40   : > { %s242_s27 = scalar_lea.hbm %s2063_s0, %s1250_s14  ;;  %s237_s6 = scalar_lea.vmem [#allocation5], %s1249_s12 }
  0x41   : > { %s1890_s15 = scalar_select %p40_p10, %s1718_s20, %s42_s10  }
  0x42   : > { %s244_s7 = sshll.u32 %s237_s6, 4  ;;  %p1897_p2 = pnand %p1442_p5, %p51_p3  ;;  %s245_s7 = int_to_ptr.vmem [resolvable:$true] %s244_s7 }
  0x43   : > { %s234_s11 = scalar_lea.sflag [#allocation6], %s233_s16  ;;  %s1627_s17 = scalar_lea.vmem %s245_s7, 128 }
  0x44   : > { %p1616_p11 = pneg %p1897_p2  ;;  %p1628_p7 = scmp.ne.s32.totalorder %s245_s7, %s1627_s17 }
  0x45   : > { %s1737_s10 = smov [#allocation5]  }
  0x46   : > { %p1630_p6 = pnand %p1628_p7, %p1616_p11  ;;  %s1632_s1 = sshll.u32 %s1737_s10, 4  ;;  %s1633_s1 = int_to_ptr.vmem [resolvable:$false] %s1632_s1 }
  0x47   : > { %s1634_s14 = scalar_lea.vmem %s1633_s1, 256  ;;  %p1635_p13 = scmp.lt.s32.totalorder %s245_s7, %s1633_s1 }
  0x48   : > { %p1631_p9 = pneg %p1630_p6  ;;  %p1636_p1 = scmp.lt.s32.totalorder %s1634_s14, %s1627_s17 }
  0x4a   : > { %p1637_p4 = por %p1636_p1, %p1635_p13 }
  0x4c   : > { %p1638_p8 = pnand %p1637_p4, %p1631_p9 }
  0x4e   : > { %1641 = shalt.err (!%p1638_p8)
}
  0x4f   : > { %1434 = dma.hbm_to_vmem [thread:$0]  (!%p1897_p2), %s242_s27, 128, %s245_s7, %s234_s11  }
  0x50   : > { %p2083_p12 = scmp.ne.s32.totalorder %s2078_s30, 0 }
  0x51   : > { %s1908_s16 = sand.u32 (!%p2083_p12), 1, %s1714_s19   ;;  %p2084_p5 = scmp.ne.s32.totalorder (!%p2083_p12), %s2076_s28, 0 }
  0x52   : > { %253 = sbr.rel (%p2083_p12) target bundleno = 2159 (0x86f), region = 40  ;;  %s1252_s12 = sshll.u32 (!%p2083_p12), %s1908_s16, 3 }
  0x53   : > { %s256_s24 = scalar_lea.sflag (!%p2083_p12), [#allocation6], %s1908_s16  ;;  %s259_s1 = scalar_lea.vmem (!%p2083_p12), [#allocation5], %s1252_s12 }
  0x57   : > { %1693 = dma.done.wait (%p2084_p5), %s256_s24, 128  }
  0x58   : > { %1695 = vsyncadd (%p2084_p5), %s256_s24, 4294967168  ;;  %p2085_p3 = scmp.ne.s32.totalorder %s2074_s26, 0 }
  0x5a   : > { %1697 = dma.done.wait (%p2085_p3), [#allocation9], 512  }
  0x5b   : > { %1699 = vsyncadd (%p2085_p3), [#allocation9], 4294966784 }
  0x5c   : > { %1701 = dma.done.wait (%p2085_p3), [#allocation12], 256  }
  0x5d   : > { %1703 = vsyncadd (%p2085_p3), [#allocation12], 4294967040  ;;  %v1738_v0 = vmov 0.0   ;;  %vm1739_vm0 = vmmov 0   ;;  %v1509_v1 = vld [vmem:[#allocation10 + $0x8] sm:$0xff]   ;;  %v1510_v2 = vld [vmem:[#allocation8 + $0x8] sm:$0xff]  }
  0x5e   : > { %1317 = vmatprep.subr.bf16.mxu0 %v1738_v0  ;;  %1325 = vmatprep.subr.bf16.mxu1 %v1738_v0  ;;  %v1511_v3 = vld [vmem:[#allocation10] sm:$0xff]   ;;  %v1512_v4 = vld [vmem:[#allocation8] sm:$0xff]   ;;  %vm321_vm1 = vcmask 261120   ;;  %vm366_vm2 = vcmask 519168   ;;  %vm434_vm3 = vcmask 257024   ;;  %vm446_vm4 = vcmask 64512  }
  0x5f   : > { %1321 = vmatprep.mubr.msk.bf16.mxu0 %vm1739_vm0, %v1738_v0  ;;  %1329 = vmatprep.mubr.msk.bf16.mxu1 %vm1739_vm0, %v1738_v0  ;;  %v303_v5 = vld [vmem:[%s259_s1] sm:$0xff]  ;;  %s1740_s26 = smov 120   ;;  %s1741_s28 = smov 96   ;;  %vm511_vm5 = vcmask 1043456   ;;  %v559_v41 = vld [vmem:[#allocation11] sm:$0xf] }
  0x60   : > { %1318 = vmatpush3.bf16.msra.mxu0 %v1509_v1  ;;  %1326 = vmatpush3.bf16.msra.mxu1 %v1510_v2  ;;  %v304_v6 = vpack.c.bf16 %v303_v5, %v303_v5  ;;  %s1742_s30 = smov 88   ;;  %s1743_s25 = smov 112   ;;  %v564_v42 = vsel %vm511_vm5, %v559_v41, 0  ;;  %v1263_v59 = vld [vmem:[%s2067_s4] ss:$0 sm:$0xff] }
  0x61   : > { %1319 = vmatprep.subr.bf16.mxu0 %v1738_v0  ;;  %1327 = vmatprep.subr.bf16.mxu1 %v1738_v0  ;;  %443 = vst.msk [vmem:[#allocation4] sm:$0xff] %vm321_vm1, %v1263_v59  ;;  %s1744_s7 = smov 80   ;;  %s1745_s9 = smov 104  }
  0x62   : > { %s1746_s11 = smov 72   ;;  %s1284_s17 = sshll.u32 %s1722_s21, 7 }
  0x63   : > { %s297_s10 = scalar_lea.vmem [#allocation13], %s1252_s12 }
  0x64   : > { %1320 = vmatpush3.bf16.msra.mxu0 %v1511_v3  ;;  %1328 = vmatpush3.bf16.msra.mxu1 %v1512_v4  ;;  %s1132_s14 = sshll.u32 %s297_s10, 4  ;;  %s1133_s14 = int_to_ptr.vmem [resolvable:$true] %s1132_s14 }
  0x65   : > { %1333 = vmatprep.subr.bf16.mxu0 %v1738_v0  ;;  %1339 = vmatprep.subr.bf16.mxu1 %v1738_v0 }
  0x67   : > { %1322 = vmatmul.mubr.msk.bf16.vlgmr.msra.gmra.mxu0 %vm321_vm1, %v304_v6  ;;  %1330 = vmatmul.mubr.msk.bf16.vlgmr.msra.gmra.mxu1 %vm321_vm1, %v304_v6 }
  0x68   : > { %1335 = vmatprep.mubr.msk.bf16.mxu0 %vm1739_vm0, %v1738_v0  ;;  %1341 = vmatprep.mubr.msk.bf16.mxu1 %vm1739_vm0, %v1738_v0 }
 0x127   : > { %v359_v7 = vpop.f32.mrf.mxu0  ;;  %v426_v9 = vpop.f32.mrf.mxu1 }
 0x128   : > { %v365_v8 = vpack.c.bf16 %v359_v7, %v359_v7  ;;  %v432_v10 = vmul.f32 0.35355338, %v426_v9  ;;  %v558_v7 = vld [vmem:[#allocation4] sm:$0xff] }
 0x129   : > { %v1323_v11 = vpop.f32.mrf.mxu0  ;;  %v1331_v12 = vpop.f32.mrf.mxu1 }
 0x12a   : > { %367 = vst.msk [vmem:[#allocation2] sm:$0xf] %vm366_vm2, %v365_v8  ;;  %v433_v13 = vpack.c.bf16 %v432_v10, %v432_v10 }
 0x12b   : > { %v362_v14 = vpop.f32.mrf.mxu0  ;;  %v429_v15 = vpop.f32.mrf.mxu1 }
 0x12c   : > { %435 = vst.msk [vmem:[#allocation3] sm:$0xf] %vm434_vm3, %v433_v13  ;;  %v728_v13 = vld [vmem:[#allocation11 + $0x4] sm:$0xf] }
 0x12d   : > { %v1324_v16 = vpop.f32.mrf.mxu0  ;;  %v1332_v17 = vpop.f32.mrf.mxu1  ;;  %v733_v14 = vsel %vm511_vm5, %v728_v13, 0 }
 0x131   : > { %v445_v18 = vld [vmem:[#allocation2] sm:$0xf] }
 0x132   : > { %v1513_v19 = vld [vmem:[#allocation2] ss:$0 sps:$4 sm:$0xff]   ;;  %v451_v20 = vsel %vm446_vm4, %v445_v18, 0  ;;  %v1265_v28 = vcombine.low %v445_v18, %v445_v18 }
 0x133   : > { %1334 = vmatpush3.bf16.xpose.msra.mxu0 %v451_v20  ;;  %618 = vrot.lane.b32.xlu1 %v1513_v19, %s1740_s26  ;;  %v1514_v21 = vld [vmem:[#allocation3] ss:$0 sps:$4 sm:$0xff]   ;;  %v1517_v58 = vld [vmem:[#allocation2] ss:$0 sps:$4 sm:$0xff]  }
 0x134   : > { %1345 = vmatprep.subr.bf16.mxu0 %v1738_v0  ;;  %v444_v22 = vld [vmem:[#allocation3] sm:$0xf] }
 0x135   : > { %v1516_v40 = vld [vmem:[#allocation3] ss:$0 sps:$4 sm:$0xff]  }
 0x136   : > { %v1518_v6 = vld [vmem:[#allocation3] ss:$0 sps:$4 sm:$0xff]  }
 0x137   : > { %613 = vrot.lane.b32.xlu1 %v1514_v21, %s1740_s26  ;;  %s2020_s26 = scalar_lea.hbm %s2068_s5, %s1284_s17 }
 0x13a   : > { %1336 = vmatmul.mubr.msk.bf16.vlgmr.msra.gmra.mxu0 %vm446_vm4, %v444_v22 }
 0x13b   : > { %1347 = vmatprep.mubr.msk.bf16.mxu0 %vm1739_vm0, %v1738_v0  ;;  %1346 = vmatpush3.bf16.msra.mxu0 %v564_v42 }
 0x13c   : > { %1357 = vmatprep.subr.bf16.mxu0 %v1738_v0 }
 0x1a5   : > { %v619_v35 = vpop.permute.xlu1 %618 }
 0x1a6   : > { %v624_v38 = vsel %vm446_vm4, %v619_v35, 0 }
 0x1a9   : > { %v614_v39 = vpop.permute.xlu1 %613 }
 0x1fa   : > { %v487_v23 = vpop.f32.mrf.mxu0 }
 0x1fb   : > { %v493_v24 = vsel %vm446_vm4, %v487_v23, -inf }
 0x1fc   : > { %494 = vmax.xlane.f32.xlu0 %v493_v24  ;;  %v1337_v25 = vpop.f32.mrf.mxu0 }
 0x1fe   : > { %v490_v26 = vpop.f32.mrf.mxu0 }
 0x200   : > { %v1338_v27 = vpop.f32.mrf.mxu0 }
 0x212   : > { %506 = vrot.lane.b32.xlu0 %v1265_v28, %s1741_s28  ;;  %s1118_s28 = scalar_lea.sflag [#allocation7], %s1908_s16 }
 0x285   : > { %v495_v29 = vpop.xlane.xlu0 %494 }
 0x286   : > { %v496_v30 = vsub.f32 %v487_v23, %v495_v29 }
 0x288   : > { %v497_v31 = vmul.f32 1.442695, %v496_v30  ;;  %v1519_v30 = vld [vmem:[#allocation2] ss:$0 sps:$4 sm:$0xff]  }
 0x289   : > { %v507_v32 = vpop.permute.xlu0 %506 }
 0x28a   : > { %1520 = vpow2.f32 %v497_v31  ;;  %v513_v33 = vsel %vm511_vm5, %v507_v32, 0 }
 0x28b   : > { %1340 = vmatpush3.bf16.msra.mxu1 %v513_v33 }
 0x28c   : > { %1351 = vmatprep.subr.bf16.mxu1 %v1738_v0 }
 0x297   : > { %v1521_v34 = vpop.eup %1520 }
 0x298   : > { %v499_v36 = vsel %vm446_vm4, %v1521_v34, 0.0  ;;  %v502_v37 = vpack.c.bf16 %v1521_v34, %v1521_v34 }
 0x299   : > { %500 = vadd.xlane.f32.xlu1 %v499_v36 }
 0x29a   : > { %1342 = vmatmul.mubr.msk.bf16.vlgmr.msra.gmra.mxu1 %vm446_vm4, %v502_v37 }
 0x29b   : > { %1352 = vmatpush3.bf16.xpose.msra.mxu1 %v624_v38  ;;  %1353 = vmatprep.mubr.msk.bf16.mxu1 %vm1739_vm0, %v1738_v0 }
 0x29c   : > { %1363 = vmatprep.subr.bf16.mxu1 %v1738_v0 }
 0x2a2   : > { %1354 = vmatmul.mubr.msk.bf16.vlgmr.msra.gmra.mxu1 %vm446_vm4, %v614_v39 }
 0x2a3   : > { %1365 = vmatprep.mubr.msk.bf16.mxu1 %vm1739_vm0, %v1738_v0  ;;  %1364 = vmatpush3.bf16.msra.mxu1 %v733_v14 }
 0x2a4   : > { %1375 = vmatprep.subr.bf16.mxu1 %v1738_v0 }
 0x2aa   : > { %676 = vrot.lane.b32.xlu1 %v1513_v19, %s1742_s30  ;;  %s1642_s30 = scalar_lea.vmem %s1133_s14, 128 }
 0x2ab   : > { %p1643_p10 = scmp.ne.s32.totalorder %s1133_s14, %s1642_s30 }
 0x2ad   : > { %p1644_p2 = pnand %p1643_p10, %p1878_p0 }
 0x2ae   : > { %782 = vrot.lane.b32.xlu1 %v1516_v40, %s1743_s25 }
 0x2af   : > { %p1645_p11 = pneg %p1644_p2 }
 0x322   : > { %v501_v43 = vpop.xlane.xlu1 %500 }
 0x323   : > { %1522 = vrcp.f32 %v501_v43 }
 0x326   : > { %v677_v47 = vpop.permute.xlu1 %676 }
 0x327   : > { %v682_v51 = vsel %vm511_vm5, %v677_v47, 0 }
 0x32a   : > { %v783_v5 = vpop.permute.xlu1 %782 }
 0x330   : > { %v1523_v44 = vpop.eup %1522 }
 0x35a   : > { %v549_v45 = vpop.f32.mrf.mxu1 }
 0x35b   : > { %v556_v46 = vmul.f32 %v1523_v44, %v549_v45 }
 0x35c   : > { %v1343_v48 = vpop.f32.mrf.mxu1 }
 0x35d   : > { %v557_v49 = vpack.c.bf16 %v556_v46, %v556_v46  ;;  %v897_v46 = vld [vmem:[#allocation11 + $0x8] sm:$0xf] }
 0x35e   : > { %v552_v50 = vpop.f32.mrf.mxu1  ;;  %v902_v47 = vsel %vm511_vm5, %v897_v46, 0 }
 0x35f   : > { %1348 = vmatmul.mubr.msk.bf16.vlgmr.msra.gmra.mxu0 %vm446_vm4, %v557_v49 }
 0x360   : > { %1358 = vmatpush3.bf16.msra.mxu0 %v682_v51  ;;  %v1344_v52 = vpop.f32.mrf.mxu1  ;;  %1359 = vmatprep.mubr.msk.bf16.mxu0 %vm1739_vm0, %v1738_v0 }
 0x361   : > { %1369 = vmatprep.subr.bf16.mxu0 %v1738_v0 }
 0x362   : > { %v660_v53 = vpop.f32.mrf.mxu1 }
 0x363   : > { %v666_v54 = vsel %vm446_vm4, %v660_v53, -inf }
 0x364   : > { %667 = vmax.xlane.f32.xlu0 %v666_v54  ;;  %v1355_v55 = vpop.f32.mrf.mxu1 }
 0x366   : > { %v663_v56 = vpop.f32.mrf.mxu1 }
 0x368   : > { %v1356_v57 = vpop.f32.mrf.mxu1 }
 0x37a   : > { %787 = vrot.lane.b32.xlu0 %v1517_v58, %s1743_s25  ;;  %s1747_s25 = smov [#allocation13]  }
 0x37b   : > { %s1646_s21 = sshll.u32 %s1747_s25, 4  ;;  %s1647_s21 = int_to_ptr.vmem [resolvable:$false] %s1646_s21 }
 0x37c   : > { %s1648_s12 = scalar_lea.vmem %s1647_s21, 256  ;;  %p1649_p7 = scmp.lt.s32.totalorder %s1133_s14, %s1647_s21 }
 0x37d   : > { %p1650_p6 = scmp.lt.s32.totalorder %s1648_s12, %s1642_s30 }
 0x37f   : > { %p1651_p9 = por %p1650_p6, %p1649_p7 }
 0x381   : > { %p1652_p13 = pnand %p1651_p9, %p1645_p11 }
 0x3ed   : > { %v668_v60 = vpop.xlane.xlu0 %667 }
 0x3ee   : > { %v669_v61 = vsub.f32 %v660_v53, %v668_v60 }
 0x3f0   : > { %v670_v62 = vmul.f32 1.442695, %v669_v61 }
 0x3f1   : > { %v788_v1 = vpop.permute.xlu0 %787 }
 0x3f2   : > { %1524 = vpow2.f32 %v670_v62  ;;  %v793_v4 = vsel %vm446_vm4, %v788_v1, 0 }
 0x3ff   : > { %v1525_v63 = vpop.eup %1524 }
 0x400   : > { %v672_v2 = vsel %vm446_vm4, %v1525_v63, 0.0  ;;  %v675_v3 = vpack.c.bf16 %v1525_v63, %v1525_v63 }
 0x401   : > { %673 = vadd.xlane.f32.xlu1 %v672_v2 }
 0x402   : > { %1360 = vmatmul.mubr.msk.bf16.vlgmr.msra.gmra.mxu0 %vm446_vm4, %v675_v3 }
 0x403   : > { %1370 = vmatpush3.bf16.xpose.msra.mxu0 %v793_v4  ;;  %1371 = vmatprep.mubr.msk.bf16.mxu0 %vm1739_vm0, %v1738_v0 }
 0x404   : > { %1381 = vmatprep.subr.bf16.mxu0 %v1738_v0 }
 0x40a   : > { %1372 = vmatmul.mubr.msk.bf16.vlgmr.msra.gmra.mxu0 %vm446_vm4, %v783_v5 }
 0x40b   : > { %1383 = vmatprep.mubr.msk.bf16.mxu0 %vm1739_vm0, %v1738_v0  ;;  %1382 = vmatpush3.bf16.msra.mxu0 %v902_v47 }
 0x40c   : > { %1393 = vmatprep.subr.bf16.mxu0 %v1738_v0 }
 0x412   : > { %845 = vrot.lane.b32.xlu1 %v1517_v58, %s1744_s7 }
 0x416   : > { %951 = vrot.lane.b32.xlu1 %v1518_v6, %s1745_s9  ;;  %v1066_v6 = vld [vmem:[#allocation11 + $0xc] sm:$0xf] }
 0x41f   : > { %v600_v8 = vpop.f32.mrf.mxu0 }
 0x420   : > { %v606_v9 = vadd.f32 %v600_v8, %v558_v7 }
 0x421   : > { %v1349_v10 = vpop.f32.mrf.mxu0 }
 0x422   : > { %607 = vst.msk [vmem:[#allocation4] sm:$0xff] %vm321_vm1, %v606_v9 }
 0x423   : > { %v603_v11 = vpop.f32.mrf.mxu0 }
 0x425   : > { %v1350_v12 = vpop.f32.mrf.mxu0 }
 0x429   : > { %v727_v40 = vld [vmem:[#allocation4] sm:$0xff] }
 0x48a   : > { %v674_v15 = vpop.xlane.xlu1 %673 }
 0x48b   : > { %1526 = vrcp.f32 %v674_v15 }
 0x48e   : > { %v846_v19 = vpop.permute.xlu1 %845 }
 0x48f   : > { %v851_v23 = vsel %vm511_vm5, %v846_v19, 0 }
 0x492   : > { %v952_v39 = vpop.permute.xlu1 %951 }
 0x498   : > { %v1527_v16 = vpop.eup %1526 }
 0x4c2   : > { %v718_v17 = vpop.f32.mrf.mxu0 }
 0x4c3   : > { %v725_v18 = vmul.f32 %v1527_v16, %v718_v17 }
 0x4c4   : > { %v1361_v20 = vpop.f32.mrf.mxu0 }
 0x4c5   : > { %v726_v21 = vpack.c.bf16 %v725_v18, %v725_v18 }
 0x4c6   : > { %v721_v22 = vpop.f32.mrf.mxu0 }
 0x4c7   : > { %1366 = vmatmul.mubr.msk.bf16.vlgmr.msra.gmra.mxu1 %vm446_vm4, %v726_v21 }
 0x4c8   : > { %1376 = vmatpush3.bf16.msra.mxu1 %v851_v23  ;;  %v1362_v24 = vpop.f32.mrf.mxu0  ;;  %1377 = vmatprep.mubr.msk.bf16.mxu1 %vm1739_vm0, %v1738_v0 }
 0x4c9   : > { %1387 = vmatprep.subr.bf16.mxu1 %v1738_v0 }
 0x4ca   : > { %v829_v25 = vpop.f32.mrf.mxu0 }
 0x4cb   : > { %v835_v26 = vsel %vm446_vm4, %v829_v25, -inf }
 0x4cc   : > { %836 = vmax.xlane.f32.xlu0 %v835_v26  ;;  %v1373_v27 = vpop.f32.mrf.mxu0 }
 0x4ce   : > { %v832_v28 = vpop.f32.mrf.mxu0 }
 0x4d0   : > { %v1374_v29 = vpop.f32.mrf.mxu0 }
 0x4e2   : > { %956 = vrot.lane.b32.xlu0 %v1519_v30, %s1745_s9 }
 0x555   : > { %v837_v31 = vpop.xlane.xlu0 %836 }
 0x556   : > { %v838_v32 = vsub.f32 %v829_v25, %v837_v31 }
 0x558   : > { %v839_v33 = vmul.f32 1.442695, %v838_v32 }
 0x559   : > { %v957_v35 = vpop.permute.xlu0 %956 }
 0x55a   : > { %1528 = vpow2.f32 %v839_v33  ;;  %v962_v38 = vsel %vm446_vm4, %v957_v35, 0 }
 0x567   : > { %v1529_v34 = vpop.eup %1528 }
 0x568   : > { %v841_v36 = vsel %vm446_vm4, %v1529_v34, 0.0  ;;  %v844_v37 = vpack.c.bf16 %v1529_v34, %v1529_v34 }
 0x569   : > { %842 = vadd.xlane.f32.xlu1 %v841_v36 }
 0x56a   : > { %1378 = vmatmul.mubr.msk.bf16.vlgmr.msra.gmra.mxu1 %vm446_vm4, %v844_v37 }
 0x56b   : > { %1388 = vmatpush3.bf16.xpose.msra.mxu1 %v962_v38  ;;  %1389 = vmatprep.mubr.msk.bf16.mxu1 %vm1739_vm0, %v1738_v0 }
 0x56c   : > { %1399 = vmatprep.subr.bf16.mxu1 %v1738_v0 }
 0x572   : > { %1390 = vmatmul.mubr.msk.bf16.vlgmr.msra.gmra.mxu1 %vm446_vm4, %v952_v39 }
 0x573   : > { %1401 = vmatprep.mubr.msk.bf16.mxu1 %vm1739_vm0, %v1738_v0 }
 0x57a   : > { %1014 = vrot.lane.b32.xlu1 %v1519_v30, %s1746_s11 }
 0x587   : > { %v769_v41 = vpop.f32.mrf.mxu1 }
 0x588   : > { %v775_v42 = vadd.f32 %v769_v41, %v727_v40 }
 0x589   : > { %v1367_v43 = vpop.f32.mrf.mxu1 }
 0x58a   : > { %776 = vst.msk [vmem:[#allocation4] sm:$0xff] %vm321_vm1, %v775_v42 }
 0x58b   : > { %v772_v44 = vpop.f32.mrf.mxu1 }
 0x58d   : > { %v1368_v45 = vpop.f32.mrf.mxu1 }
 0x591   : > { %v896_v7 = vld [vmem:[#allocation4] sm:$0xff] }
 0x5f2   : > { %v843_v48 = vpop.xlane.xlu1 %842 }
 0x5f3   : > { %1530 = vrcp.f32 %v843_v48 }
 0x5f6   : > { %v1015_v52 = vpop.permute.xlu1 %1014 }
 0x5f7   : > { %v1020_v56 = vsel %vm511_vm5, %v1015_v52, 0 }
 0x600   : > { %v1531_v49 = vpop.eup %1530 }
 0x62a   : > { %v887_v50 = vpop.f32.mrf.mxu1 }
 0x62b   : > { %v894_v51 = vmul.f32 %v1531_v49, %v887_v50 }
 0x62c   : > { %v1379_v53 = vpop.f32.mrf.mxu1 }
 0x62d   : > { %v895_v54 = vpack.c.bf16 %v894_v51, %v894_v51 }
 0x62e   : > { %v890_v55 = vpop.f32.mrf.mxu1 }
 0x62f   : > { %1384 = vmatmul.mubr.msk.bf16.vlgmr.msra.gmra.mxu0 %vm446_vm4, %v895_v54 }
 0x630   : > { %1394 = vmatpush3.bf16.msra.mxu0 %v1020_v56  ;;  %v1380_v57 = vpop.f32.mrf.mxu1  ;;  %1395 = vmatprep.mubr.msk.bf16.mxu0 %vm1739_vm0, %v1738_v0  ;;  %v1071_v0 = vsel %vm511_vm5, %v1066_v6, 0 }
 0x631   : > { %1400 = vmatpush3.bf16.msra.mxu1 %v1071_v0 }
 0x632   : > { %v998_v58 = vpop.f32.mrf.mxu1 }
 0x633   : > { %v1004_v59 = vsel %vm446_vm4, %v998_v58, -inf }
 0x634   : > { %1005 = vmax.xlane.f32.xlu0 %v1004_v59  ;;  %v1391_v60 = vpop.f32.mrf.mxu1 }
 0x636   : > { %v1001_v61 = vpop.f32.mrf.mxu1 }
 0x638   : > { %v1392_v62 = vpop.f32.mrf.mxu1 }
 0x6bd   : > { %v1006_v63 = vpop.xlane.xlu0 %1005 }
 0x6be   : > { %v1007_v1 = vsub.f32 %v998_v58, %v1006_v63 }
 0x6c0   : > { %v1008_v2 = vmul.f32 1.442695, %v1007_v1 }
 0x6c2   : > { %1532 = vpow2.f32 %v1008_v2 }
 0x6cf   : > { %v1533_v3 = vpop.eup %1532 }
 0x6d0   : > { %v1010_v4 = vsel %vm446_vm4, %v1533_v3, 0.0  ;;  %v1013_v5 = vpack.c.bf16 %v1533_v3, %v1533_v3 }
 0x6d1   : > { %1011 = vadd.xlane.f32.xlu0 %v1010_v4 }
 0x6d2   : > { %1396 = vmatmul.mubr.msk.bf16.vlgmr.msra.gmra.mxu0 %vm446_vm4, %v1013_v5 }
 0x6ef   : > { %v938_v8 = vpop.f32.mrf.mxu0 }
 0x6f0   : > { %v944_v9 = vadd.f32 %v938_v8, %v896_v7 }
 0x6f1   : > { %v1385_v10 = vpop.f32.mrf.mxu0 }
 0x6f2   : > { %945 = vst.msk [vmem:[#allocation4] sm:$0xff] %vm321_vm1, %v944_v9 }
 0x6f3   : > { %v941_v11 = vpop.f32.mrf.mxu0 }
 0x6f5   : > { %v1386_v12 = vpop.f32.mrf.mxu0 }
 0x6f9   : > { %v1065_v21 = vld [vmem:[#allocation4] sm:$0xff] }
 0x75a   : > { %v1012_v13 = vpop.xlane.xlu0 %1011 }
 0x75b   : > { %1534 = vrcp.f32 %v1012_v13 }
 0x768   : > { %v1535_v14 = vpop.eup %1534 }
 0x792   : > { %v1056_v15 = vpop.f32.mrf.mxu0 }
 0x793   : > { %v1063_v16 = vmul.f32 %v1535_v14, %v1056_v15 }
 0x794   : > { %v1397_v17 = vpop.f32.mrf.mxu0 }
 0x795   : > { %v1064_v18 = vpack.c.bf16 %v1063_v16, %v1063_v16 }
 0x796   : > { %v1059_v19 = vpop.f32.mrf.mxu0 }
 0x797   : > { %1402 = vmatmul.mubr.msk.bf16.vlgmr.msra.gmra.mxu1 %vm446_vm4, %v1064_v18 }
 0x798   : > { %v1398_v20 = vpop.f32.mrf.mxu0 }
 0x857   : > { %v1107_v22 = vpop.f32.mrf.mxu1 }
 0x858   : > { %v1113_v23 = vadd.f32 %v1107_v22, %v1065_v21 }
 0x859   : > { %v1403_v24 = vpop.f32.mrf.mxu1 }
 0x85a   : > { %1114 = vst.msk [vmem:[#allocation4] sm:$0xff] %vm321_vm1, %v1113_v23 }
 0x85b   : > { %v1110_v25 = vpop.f32.mrf.mxu1 }
 0x85d   : > { %v1404_v26 = vpop.f32.mrf.mxu1 }
 0x861   : > { %v1115_v27 = vld [vmem:[#allocation4] sm:$0xff] }
 0x862   : > { %1116 = vst.msk [vmem:[%s297_s10] sm:$0xff] %vm321_vm1, %v1115_v27 }
 0x863   : > { %1655 = shalt.err (!%p1652_p13)
}
 0x864   : > { %s1656_s27 = scalar_lea.hbm %s2020_s26, 128  ;;  %s1660_s7 = scalar_lea.hbm %s2068_s5, 256 }
 0x865   : > { %p1657_p1 = scmp.ne.s32.totalorder %s2020_s26, %s1656_s27  ;;  %p1661_p12 = scmp.lt.s32.totalorder %s2020_s26, %s2068_s5 }
 0x866   : > { %p1662_p5 = scmp.lt.s32.totalorder %s1660_s7, %s1656_s27 }
 0x867   : > { %p1658_p4 = pnand %p1657_p1, %p1878_p0 }
 0x868   : > { %p1663_p3 = por %p1662_p5, %p1661_p12 }
 0x869   : > { %p1659_p8 = pneg %p1658_p4 }
 0x86b   : > { %p1664_p10 = pnand %p1663_p3, %p1659_p8 }
 0x86d   : > { %1667 = shalt.err (!%p1664_p10)
}
 0x86e   : > { %1419 = dma.vmem_to_hbm [thread:$0]  (%p1878_p0), %s1133_s14, 128, %s2020_s26, %s1118_s28  }
 0x86f PF: > { %s1144_s17 = sand.u32 1, %s1710_s18   ;;  %p2086_p2 = scmp.ne.s32.totalorder %s2077_s29, 0 }
 0x870   : > { %p2087_p11 = scmp.ge.s32.totalorder %s1730_s23, 2  ;;  %s1145_s10 = scalar_lea.sflag [#allocation7], %s1144_s17 }
 0x872   : > { %p1436_p7 = pnand %p2087_p11, %p2086_p2 }
 0x874   : > { %p1437_p6 = pneg %p1436_p7 }
 0x876   : > { %1705 = dma.done.wait (%p1437_p6), %s1145_s10, 128  }
 0x877   : > { %1707 = vsyncadd (%p1437_p6), %s1145_s10, 4294967168  ;;  %s23_s23 = sadd.s32 1, %s1730_s23   ;;  %s2088_s18 = smov %s1714_s19 }
 0x878   : > { %p20_p9 = scmp.ge.s32.totalorder %s23_s23, 4   ;;  %s2089_s19 = smov %s1718_s20 }
 0x879   : > { %s2090_s20 = smov %s1890_s15  ;;  %s2091_s21 = smov %s1726_s22 }
 0x87a   : > { %s2092_s22 = smov %s2094_s13  ;;  %22 = sbr.rel (!%p20_p9) target bundleno = 10 (0xa), region = 102 }
 0x87f   :  { %1150 = vsyncpa [#allocation6], 1 }
 0x880   :  { %1152 = vsyncpa [#allocation6 + $0x1], 1 }
 0x881   :  { %1153 = vsyncpa [#allocation9], 1 }
 0x882   :  { %1154 = vsyncpa [#allocation12], 1 }
 0x883   :  { %1155 = vsyncpa [#allocation7], 1 }
 0x884   :  { %1157 = vsyncpa [#allocation7 + $0x1], 1 }

</bundles_post_ra>
